<compile_context>
chip_gen: v7x
topology: tpu7x:2x2x1
jax: 0.10.0
libtpu: 0.0.40
codegen_flags: <defaults>
</compile_context>

<pallas_src>
import math
from functools import partial

import numpy as np

import jax
import jax.numpy as jnp
from jax.experimental import pallas as pl
from jax.experimental.pallas import tpu as pltpu


# ----------------------------------------------------------------------------
# Pallas kernel: CB channels per grid step, two 2-D MXU matmuls per channel.
#   img_ref : (CB, H, W)  input dtype (cast to bf16 in-kernel)
#   wh_ref  : (S,  H)     bf16, vertical resample weights (crop folded in)
#   wwT_ref : (W,  P)     bf16, horizontal resample weights^T (crop folded in,
#                         P = size padded up to a multiple of 128 lanes)
#   out_ref : (CB, S, P)  lane-dense output block
# ----------------------------------------------------------------------------
def _resize_kernel(img_ref, wh_ref, wwT_ref, out_ref):
    cb = img_ref.shape[0]

    @pl.loop(0, cb)
    def _(c):
        xc = img_ref[c].astype(jnp.bfloat16)                       # (H, W)
        # vertical pass first (H -> S): S*H*W MACs, small (S, W) f32 temp
        t = jnp.dot(wh_ref[...], xc,
                    preferred_element_type=jnp.float32)            # (S, W)
        # horizontal pass (W -> P): S*W*P MACs
        o = jnp.dot(t.astype(jnp.bfloat16), wwT_ref[...],
                    preferred_element_type=jnp.float32)            # (S, P)
        out_ref[c] = o.astype(out_ref.dtype)


def _round_up(x, m):
    return ((x + m - 1) // m) * m


# ----------------------------------------------------------------------------
# Hardware query (generation-aware VMEM budget / core count), with fallbacks.
# ----------------------------------------------------------------------------
def _tpu_vmem_and_cores():
    kind = ""
    try:
        kind = jax.devices()[0].device_kind.lower()
    except Exception:
        pass
    vmem_cap = None
    try:
        vmem_cap = int(pltpu.get_tpu_info().vmem_capacity_bytes)
    except Exception:
        vmem_cap = None
    if vmem_cap is None:
        if not kind:
            vmem_cap = 64 * 1024 * 1024                 # conservative default
        elif "7" in kind:
            vmem_cap = 64 * 1024 * 1024                 # v7x: 64 MiB / TC
        else:
            vmem_cap = 128 * 1024 * 1024                # v5e / v6e
    two_cores = "7" in kind                             # v7x: 2 TensorCores
    return vmem_cap, two_cores


def _pick_channel_block(nc, in_bytes_per_chan, out_bytes_per_chan,
                        weight_bytes, budget_bytes, two_cores):
    """Largest divisor of nc whose per-step VMEM footprint fits the budget.

    Weights are counted once (Buffered(1), resident); input/output blocks are
    double-buffered.  On 2-TC chips prefer an even number of grid steps so the
    'parallel' axis splits evenly; on 1-TC chips CB = NC is allowed.
    """

    def est(cb):
        return (2 * cb * in_bytes_per_chan          # input block, double-buffered
                + 2 * cb * out_bytes_per_chan       # output block, double-buffered
                + weight_bytes                      # resident bf16 weights (once)
                + (2 << 20))                        # temps / internal scratch margin

    fits = [d for d in range(1, nc + 1) if nc % d == 0 and est(d) <= budget_bytes]
    if not fits:
        return 1
    if two_cores:
        even = [d for d in fits if (nc // d) % 2 == 0]
        if even:
            return max(even)
    return max(fits)


# ----------------------------------------------------------------------------
# pallas_call wrapper
# ----------------------------------------------------------------------------
def _pallas_crop_resize(img_nc, wh, wwT, cb, out_dtype, vmem_limit):
    """img_nc: (NC,H,W); wh: (S,H) bf16; wwT: (W,P) bf16 -> (NC,S,P)."""
    nc, height, width = img_nc.shape
    s = wh.shape[0]
    p = wwT.shape[1]
    assert nc % cb == 0
    return pl.pallas_call(
        _resize_kernel,
        out_shape=jax.ShapeDtypeStruct((nc, s, p), out_dtype),
        grid=(nc // cb,),
        in_specs=[
            pl.BlockSpec((cb, height, width), lambda g: (g, 0, 0)),
            # constant index_map -> fetched once, revisited: single buffer
            pl.BlockSpec((s, height), lambda g: (0, 0),
                         pipeline_mode=pl.Buffered(1)),
            pl.BlockSpec((width, p), lambda g: (0, 0),
                         pipeline_mode=pl.Buffered(1)),
        ],
        out_specs=pl.BlockSpec((cb, s, p), lambda g: (g, 0, 0)),
        compiler_params=pltpu.CompilerParams(
            dimension_semantics=("parallel",),
            vmem_limit_bytes=int(vmem_limit),
        ),
    )(img_nc, wh, wwT)


# ----------------------------------------------------------------------------
# Resize weight matrices (PIL / torchvision antialiased bilinear filter) with
# the crop window folded in: zero outside [start, start+crop_len).  Built on
# device from scalar (i, j, h, w) so there is no per-call host->device copy.
# ----------------------------------------------------------------------------
def _crop_resize_weights_dev(full_in, start, crop_len, out_size, out_pad,
                             antialias):
    start_f = jnp.asarray(start, jnp.float32)
    crop_f = jnp.asarray(crop_len, jnp.float32)
    scale = crop_f / float(out_size)
    support = jnp.maximum(scale, 1.0) if antialias else jnp.float32(1.0)
    centers = (jnp.arange(out_size, dtype=jnp.float32) + 0.5) * scale   # (out,)
    pos = jnp.arange(full_in, dtype=jnp.float32) + 0.5 - start_f        # (full,)
    x = (pos[None, :] - centers[:, None]) / support
    wts = jnp.maximum(1.0 - jnp.abs(x), 0.0)                            # triangle
    valid = jnp.logical_and(pos > 0.0, pos < crop_f)                    # crop window
    wts = wts * valid[None, :].astype(jnp.float32)
    wts = wts / wts.sum(axis=1, keepdims=True)
    if out_pad > out_size:
        wts = jnp.pad(wts, ((0, out_pad - out_size), (0, 0)))
    return wts                                                          # (out_pad, full_in)


@partial(jax.jit,
         static_argnames=("size_hw", "out_pad", "antialias", "cb", "vmem_limit"))
def _device_forward(img, i, j, h, w, *, size_hw, out_pad, antialias, cb,
                    vmem_limit):
    n, c, height, width = img.shape
    s_h, s_w = size_hw
    # crop folded into the weight matrices (zeros outside the window): shapes
    # depend only on (H, W, size) -> a single kernel compile serves all crops.
    wh = _crop_resize_weights_dev(height, i, h, s_h, s_h, antialias)    # (S, H)
    ww = _crop_resize_weights_dev(width, j, w, s_w, out_pad, antialias) # (P, W)
    wh_b = wh.astype(jnp.bfloat16)
    wwT_b = ww.T.astype(jnp.bfloat16)                                   # (W, P)

    # accept uint8 / bf16 / f32 inputs; integer inputs produce float32 output
    out_dtype = img.dtype if jnp.issubdtype(img.dtype, jnp.floating) else jnp.float32

    img_nc = img.reshape(n * c, height, width)                          # free reshape
    out3 = _pallas_crop_resize(img_nc, wh_b, wwT_b, cb, out_dtype,
                               vmem_limit)                              # (NC, S, P)
    # lane-padding slice + un-flatten fuse into one copy inside this jit
    return out3[:, :, :s_w].reshape(n, c, s_h, s_w)


def _host_rng_from_key(key):
    """Derive a numpy Generator from a JAX PRNG key (single tiny D2H copy)."""
    try:
        if jnp.issubdtype(key.dtype, jax.dtypes.prng_key):
            data = jax.random.key_data(key)
        else:
            data = key
    except Exception:
        data = key
    words = np.asarray(jax.device_get(data)).astype(np.uint32).ravel()
    return np.random.default_rng([int(v) for v in words])


# ----------------------------------------------------------------------------
# Module wrapper
# ----------------------------------------------------------------------------
class RandomResizedCrop:
    def __init__(self, size, scale=(0.08, 1.0), ratio=(3.0 / 4.0, 4.0 / 3.0),
                 antialias=True):
        self.size = (size, size)
        self.scale = scale
        self.ratio = ratio
        self.antialias = antialias

    @staticmethod
    def get_params(rng, height, width, scale, ratio):
        # Host-side, all randoms drawn in one batch (no device syncs).
        area = float(height) * float(width)
        log_ratio = (math.log(ratio[0]), math.log(ratio[1]))
        u_area = rng.uniform(scale[0], scale[1], size=10)
        u_logr = rng.uniform(log_ratio[0], log_ratio[1], size=10)
        u_pos = rng.random(size=(10, 2))
        for t in range(10):
            target_area = area * float(u_area[t])
            aspect_ratio = math.exp(float(u_logr[t]))
            w = int(round(math.sqrt(target_area * aspect_ratio)))
            h = int(round(math.sqrt(target_area / aspect_ratio)))
            if 0 < w <= width and 0 < h <= height:
                i = min(int(u_pos[t, 0] * (height - h + 1)), height - h)
                j = min(int(u_pos[t, 1] * (width - w + 1)), width - w)
                return i, j, h, w
        # fallback: center crop
        in_ratio = float(width) / float(height)
        if in_ratio < min(ratio):
            w = width
            h = int(round(w / min(ratio)))
        elif in_ratio > max(ratio):
            h = height
            w = int(round(h * max(ratio)))
        else:
            w = width
            h = height
        i = (height - h) // 2
        j = (width - w) // 2
        return i, j, h, w

    def __call__(self, img, key):
        # img: (N, C, H, W)
        n, c, height, width = img.shape
        rng = _host_rng_from_key(key)   # one tiny D2H sync for the key
        i, j, h, w = self.get_params(rng, height, width, self.scale, self.ratio)

        s_h, s_w = self.size
        p = _round_up(max(s_w, 1), 128)        # lane-padded output width

        nc = n * c
        in_item = jnp.dtype(img.dtype).itemsize
        out_dtype = img.dtype if jnp.issubdtype(img.dtype, jnp.floating) else jnp.float32
        out_item = jnp.dtype(out_dtype).itemsize

        vmem_cap, two_cores = _tpu_vmem_and_cores()
        vmem_limit = max(32 << 20, min((vmem_cap * 3) // 4, 100 << 20))
        budget = (vmem_limit * 4) // 5
        weight_bytes = (s_h * height + width * p) * 2     # bf16, single-buffered
        cb = _pick_channel_block(nc, height * width * in_item, s_h * p * out_item,
                                 weight_bytes, budget, two_cores)

        return _device_forward(img, i, j, h, w,
                               size_hw=(s_h, s_w), out_pad=p,
                               antialias=self.antialias, cb=cb,
                               vmem_limit=vmem_limit)


if __name__ == "__main__":
    key = jax.random.PRNGKey(0)
    k_img, k_crop = jax.random.split(key)

    # small deterministic input, NCHW
    x = jax.random.normal(k_img, (2, 4, 16, 16), dtype=jnp.float32)

    module = RandomResizedCrop(size=8)
    y = module(x, k_crop)
    y = jax.block_until_ready(y)

    assert y.shape == (2, 4, 8, 8), y.shape
    assert y.dtype == jnp.float32
    assert bool(jnp.all(jnp.isfinite(y)))
    print("KERNEL_OK")
</pallas_src>

<mosaic_0001>
module attributes {stable_mosaic.version = 11 : i64} {
  func.func @_resize_kernel(%arg0: i32, %arg1: memref<8x16x16xf32, #tpu.memory_space<vmem>>, %arg2: memref<8x16xbf16, #tpu.memory_space<vmem>>, %arg3: memref<16x128xbf16, #tpu.memory_space<vmem>>, %arg4: memref<8x8x128xf32, #tpu.memory_space<vmem>>) attributes {dimension_semantics = [#tpu.dimension_semantics<parallel>], iteration_bounds = array<i64: 1>, scalar_prefetch = 0 : i64, scratch_operands = 0 : i64, tpu.core_type = #tpu.core_type<tc>, window_params = [{transform_indices = @transform_0, window_bounds = array<i64: 8, 16, 16>}, {pipeline_mode = #tpu.pipeline_mode<synchronous>, transform_indices = @transform_1, window_bounds = array<i64: 8, 16>}, {pipeline_mode = #tpu.pipeline_mode<synchronous>, transform_indices = @transform_2, window_bounds = array<i64: 16, 128>}, {transform_indices = @transform_3, window_bounds = array<i64: 8, 8, 128>}]} {
    %c0_i32 = arith.constant 0 : i32
    %c8_i32 = arith.constant 8 : i32
    %0 = arith.addi %c0_i32, %c8_i32 : i32
    %c1_i32 = arith.constant 1 : i32
    scf.for %arg5 = %c0_i32 to %0 step %c1_i32  : i32 {
      %c1_i32_1 = arith.constant 1 : i32
      %1 = arith.muli %arg5, %c1_i32_1 : i32
      %c0_i32_2 = arith.constant 0 : i32
      %2 = arith.addi %c0_i32_2, %1 : i32
      %3 = arith.index_cast %2 : i32 to index
      %c0 = arith.constant 0 : index
      %c0_3 = arith.constant 0 : index
      %4 = vector.load %arg1[%3, %c0, %c0_3] : memref<8x16x16xf32, #tpu.memory_space<vmem>>, vector<1x16x16xf32>
      %5 = vector.shape_cast %4 : vector<1x16x16xf32> to vector<16x16xf32>
      %6 = arith.truncf %5 : vector<16x16xf32> to vector<16x16xbf16>
      %c0_4 = arith.constant 0 : index
      %c0_5 = arith.constant 0 : index
      %7 = vector.load %arg2[%c0_4, %c0_5] : memref<8x16xbf16, #tpu.memory_space<vmem>>, vector<8x16xbf16>
      %cst = arith.constant dense<0.000000e+00> : vector<8x16xf32>
      %8 = tpu.matmul %7, %6, %cst {dimension_numbers = #tpu.dot_dimension_numbers<[1], [0], [0], [1], [0, 0, 1, 1], [], []>} : vector<8x16xbf16>, vector<16x16xbf16>, vector<8x16xf32> -> vector<8x16xf32>
      %9 = arith.truncf %8 : vector<8x16xf32> to vector<8x16xbf16>
      %c0_6 = arith.constant 0 : index
      %c0_7 = arith.constant 0 : index
      %10 = vector.load %arg3[%c0_6, %c0_7] : memref<16x128xbf16, #tpu.memory_space<vmem>>, vector<16x128xbf16>
      %cst_8 = arith.constant dense<0.000000e+00> : vector<8x128xf32>
      %11 = tpu.matmul %9, %10, %cst_8 {dimension_numbers = #tpu.dot_dimension_numbers<[1], [0], [0], [1], [0, 0, 1, 1], [], []>} : vector<8x16xbf16>, vector<16x128xbf16>, vector<8x128xf32> -> vector<8x128xf32>
      %12 = arith.index_cast %2 : i32 to index
      %c0_9 = arith.constant 0 : index
      %c0_10 = arith.constant 0 : index
      %13 = vector.load %arg4[%12, %c0_9, %c0_10] : memref<8x8x128xf32, #tpu.memory_space<vmem>>, vector<1x8x128xf32>
      %14 = vector.shape_cast %13 : vector<1x8x128xf32> to vector<8x128xf32>
      %15 = vector.shape_cast %11 : vector<8x128xf32> to vector<1x8x128xf32>
      tpu.vector_store %arg4[%12, %c0_9, %c0_10], %15 {strides = array<i32>} : memref<8x8x128xf32, #tpu.memory_space<vmem>>, vector<1x8x128xf32>,
    }
    %c8_i32_0 = arith.constant 8 : i32
    return
  }
  func.func @transform_0(%arg0: i32) -> (i32, i32, i32) {
    %c0_i32 = arith.constant 0 : i32
    %c0_i32_0 = arith.constant 0 : i32
    %c0_i32_1 = arith.constant 0 : i32
    return %arg0, %c0_i32, %c0_i32_0 : i32, i32, i32
  }
  func.func @transform_1(%arg0: i32) -> (i32, i32) {
    %c0_i32 = arith.constant 0 : i32
    %c0_i32_0 = arith.constant 0 : i32
    %c0_i32_1 = arith.constant 0 : i32
    return %c0_i32, %c0_i32_0 : i32, i32
  }
  func.func @transform_2(%arg0: i32) -> (i32, i32) {
    %c0_i32 = arith.constant 0 : i32
    %c0_i32_0 = arith.constant 0 : i32
    %c0_i32_1 = arith.constant 0 : i32
    return %c0_i32, %c0_i32_0 : i32, i32
  }
  func.func @transform_3(%arg0: i32) -> (i32, i32, i32) {
    %c0_i32 = arith.constant 0 : i32
    %c0_i32_0 = arith.constant 0 : i32
    %c0_i32_1 = arith.constant 0 : i32
    return %arg0, %c0_i32, %c0_i32_0 : i32, i32, i32
  }
}

</mosaic_0001>

<bundles_post_ra>
// kernel: _device_forward.1
= control target key start
LH: loop header
LB: loop body
LE: loop exit
PB: predicated region body
PF: predicated region fallthrough
CT: control target
= control target key end

     0   :  { %8 = vsyncpa [#allocation3], 0  ;;  %s436_s0 = inlined_call_operand.hbm [shape: f32[8,16,16], index: 0, kind: input, shape index: {}]   ;;  %s437_s1 = inlined_call_operand.hbm [shape: bf16[8,16], index: 1, kind: input, shape index: {}]   ;;  %s438_s2 = inlined_call_operand.hbm [shape: bf16[16,128], index: 2, kind: input, shape index: {}]   ;;  %s439_s3 = inlined_call_operand.hbm [shape: f32[8,8,128], index: 3, kind: output, shape index: {}]  }
   0x1   :  { %9 = vsyncpa [#allocation6], 0 }
   0x2   :  { %10 = vsyncpa [#allocation4], 0  ;;  %s335_s12 = smov [#allocation5]   ;;  %s336_s14 = smov [#allocation2]  }
   0x3   :  { %s29_s13 = sshll.u32 %s335_s12, 4  ;;  %s16_s15 = sshll.u32 %s336_s14, 4  ;;  %s30_s13 = int_to_ptr.vmem [resolvable:$true] %s29_s13  ;;  %s365_s15 = int_to_ptr.vmem [resolvable:$true] %s16_s15 }
   0x4   :  { %s233_s18 = scalar_lea.hbm %s437_s1, 64 }
   0x5   :  { %p234_p0 = scmp.ne.s32.totalorder %s437_s1, %s233_s18  ;;  %p237_p1 = scmp.lt.u32.totalorder %s233_s18, %s437_s1 }
   0x7   :  { %p239_p2 = pnand %p237_p1, %p234_p0 }
   0x9   :  { %242 = shalt.err (!%p239_p2)
}
   0xa   :  { %s243_s23 = scalar_lea.vmem %s30_s13, 64  ;;  %p248_p4 = scmp.lt.s32.totalorder %s30_s13, %s30_s13 }
   0xb   :  { %p244_p3 = scmp.ne.s32.totalorder %s30_s13, %s243_s23  ;;  %p249_p5 = scmp.lt.s32.totalorder %s243_s23, %s243_s23 }
   0xd   :  { %p250_p6 = por %p249_p5, %p248_p4 }
   0xf   :  { %p251_p7 = pnand %p250_p6, %p244_p3 }
  0x11   :  { %254 = shalt.err (!%p251_p7)
}
  0x12   :  { %32 = dma.hbm_to_vmem [thread:$0]  %s437_s1, 64, %s30_s13, [#allocation6]  }
  0x13   :  { %s255_s28 = scalar_lea.hbm %s436_s0, 2048 }
  0x14   :  { %p256_p8 = scmp.ne.s32.totalorder %s436_s0, %s255_s28  ;;  %p259_p9 = scmp.lt.u32.totalorder %s255_s28, %s436_s0 }
  0x16   :  { %p261_p10 = pnand %p259_p9, %p256_p8 }
  0x18   :  { %264 = shalt.err (!%p261_p10)
}
  0x19   :  { %s265_s6 = scalar_lea.vmem %s365_s15, 2048  ;;  %p270_p12 = scmp.lt.s32.totalorder %s365_s15, %s365_s15 }
  0x1a   :  { %p266_p11 = scmp.ne.s32.totalorder %s365_s15, %s265_s6  ;;  %p271_p13 = scmp.lt.s32.totalorder %s265_s6, %s265_s6 }
  0x1c   :  { %p272_p0 = por %p271_p13, %p270_p12 }
  0x1e   :  { %p273_p1 = pnand %p272_p0, %p266_p11 }
  0x20   :  { %276 = shalt.err (!%p273_p1)
}
  0x21   :  { %s337_s1 = smov 128   ;;  %s338_s7 = smov 8  }
  0x22   :  { %22 = dma.hbm_to_vmem [thread:$0]  %s436_s0, 2048, %s365_s15, [#allocation3], %s337_s1, %s337_s1, %s338_s7  }
  0x23   :  { %s339_s10 = smov [#allocation7]   ;;  %s277_s14 = scalar_lea.hbm %s438_s2, 128 }
  0x24   :  { %s38_s11 = sshll.u32 %s339_s10, 4  ;;  %p278_p2 = scmp.ne.s32.totalorder %s438_s2, %s277_s14  ;;  %s39_s11 = int_to_ptr.vmem [resolvable:$true] %s38_s11 }
  0x25   :  { %p281_p3 = scmp.lt.u32.totalorder %s277_s14, %s438_s2 }
  0x27   :  { %p283_p4 = pnand %p281_p3, %p278_p2 }
  0x29   :  { %286 = shalt.err (!%p283_p4)
}
  0x2a   :  { %s287_s20 = scalar_lea.vmem %s39_s11, 128  ;;  %p292_p6 = scmp.lt.s32.totalorder %s39_s11, %s39_s11 }
  0x2b   :  { %p288_p5 = scmp.ne.s32.totalorder %s39_s11, %s287_s20  ;;  %p293_p7 = scmp.lt.s32.totalorder %s287_s20, %s287_s20 }
  0x2d   :  { %p294_p8 = por %p293_p7, %p292_p6 }
  0x2f   :  { %p295_p9 = pnand %p294_p8, %p288_p5 }
  0x31   :  { %298 = shalt.err (!%p295_p9)
}
  0x32   :  { %s340_s0 = smov 64   ;;  %s341_s15 = smov 4  }
  0x33   :  { %44 = dma.hbm_to_vmem [thread:$0]  %s438_s2, 128, %s39_s11, [#allocation6], %s340_s0, %s340_s0, %s341_s15  }
  0x34   :  { %325 = dma.done.wait [#allocation3], 2048  }
  0x35   :  { %326 = vsyncadd [#allocation3], 4294965248 }
  0x36   :  { %327 = dma.done.wait [#allocation6], 192  }
  0x37   :  { %328 = vsyncadd [#allocation6], 4294967104  ;;  %s411_s23 = smov 0  }
  0x38 LB: > { %v342_v0 = vmov 0.0   ;;  %vm343_vm0 = vmmov 0   ;;  %s193_s24 = sshll.u32 %s333_s23, 4  ;;  %v66_v4 = vld [vmem:[#allocation5] sm:$0xf]  ;;  %vm67_vm1 = vcmask 130048   ;;  %s333_s23 = sphi %s411_s23, %s60_s23  }
  0x39   : > { %202 = vmatprep.subr.bf16.mxu0 %v342_v0  ;;  %204 = vmatprep.mubr.msk.bf16.mxu0 %vm343_vm0, %v342_v0  ;;  %s62_s2 = scalar_lea.vmem [#allocation2], %s193_s24  ;;  %v232_v5 = vld [vmem:[#allocation7] sm:$0xff]   ;;  %s197_s25 = sshll.u32 %s333_s23, 3 }
  0x3a   : > { %208 = vmatprep.subr.bf16.mxu1 %v342_v0  ;;  %210 = vmatprep.mubr.msk.bf16.mxu1 %vm343_vm0, %v342_v0  ;;  %v63_v1 = vld [vmem:[%s62_s2] sm:$0xff]  ;;  %v64_v2 = vld [vmem:[%s62_s2 + $0x8] sm:$0xff]  ;;  %s164_s26 = scalar_lea.vmem [#allocation8], %s197_s25  ;;  %s60_s23 = sadd.s32 1, %s333_s23  }
  0x3b   : > { %v65_v3 = vpack.c.bf16 %v64_v2, %v63_v1  ;;  %209 = vmatpush3.bf16.msra.mxu1 %v232_v5  ;;  %p57_p10 = scmp.ge.s32.totalorder %s60_s23, 8  }
  0x3c   :  { %s344_s27 = smov (%p57_p10), [#allocation8]  }
  0x3d   : > { %203 = vmatpush3.bf16.msra.mxu0 %v65_v3  ;;  %s171_s28 = sshll.u32 (%p57_p10), %s344_s27, 4  ;;  %s172_s28 = int_to_ptr.vmem [resolvable:$true] %s171_s28 }
  0x3e   :  { %s299_s29 = scalar_lea.vmem (%p57_p10), %s172_s28, 1024  ;;  %p304_p12 = scmp.lt.s32.totalorder (%p57_p10), %s172_s28, %s172_s28 }
  0x3f   :  { %p300_p11 = scmp.ne.s32.totalorder (%p57_p10), %s172_s28, %s299_s29  ;;  %p305_p13 = scmp.lt.s32.totalorder (%p57_p10), %s299_s29, %s299_s29 }
  0x40   : > { %205 = vmatmul.mubr.msk.bf16.vlgmr.msra.gmra.mrb[0].mxu0 %vm67_vm1, %v66_v4 }
  0x41   :  { %p306_p0 = por (%p57_p10), %p305_p13, %p304_p12 }
  0x43   :  { %p307_p1 = pnand (%p57_p10), %p306_p0, %p300_p11 }
 0x113   : > { %v105_v6 = vpop.f32.mrb[0].mxu0 }
 0x114   : > { %v111_v7 = vpack.c.bf16 %v105_v6, %v105_v6  ;;  %v206_v8 = vpop.f32.mrb[1].mxu0 }
 0x115   : > { %v108_v9 = vpop.f32.mrb[2].mxu0 }
 0x116   : > { %v207_v10 = vpop.f32.mrb[3].mxu0  ;;  %211 = vmatmul.mubr.msk.bf16.vlgmr.msra.gmra.mrb[0].mxu1 %vm67_vm1, %v111_v7 }
 0x1e6   :  { %59 = sbr.rel (!%p57_p10) target bundleno = 56 (0x38), region = 53 }
 0x1e9   : > { %v157_v11 = vpop.f32.mrb[0].mxu1 }
 0x1ea   : > { %165 = vst [vmem:[%s164_s26] sm:$0xff] %v157_v11  ;;  %v212_v12 = vpop.f32.mrb[1].mxu1 }
 0x1eb   : > { %v160_v13 = vpop.f32.mrb[2].mxu1 }
 0x1ec   : > { %v213_v14 = vpop.f32.mrb[3].mxu1 }
 0x1ed   :  { %310 = shalt.err (!%p307_p1)
}
 0x1ee   :  { %s311_s5 = scalar_lea.hbm %s439_s3, 1024 }
 0x1ef   :  { %p312_p2 = scmp.ne.s32.totalorder %s439_s3, %s311_s5  ;;  %p315_p3 = scmp.lt.u32.totalorder %s311_s5, %s439_s3 }
 0x1f1   :  { %p317_p4 = pnand %p315_p3, %p312_p2 }
 0x1f3   :  { %320 = shalt.err (!%p317_p4)
}
 0x1f4   :  { %177 = dma.vmem_to_hbm [thread:$0]  %s172_s28, 1024, %s439_s3, [#allocation4], %s337_s1, %s337_s1, %s338_s7  }
 0x1f5   :  { %329 = dma.done.wait [#allocation4], 1024  }
 0x1f6   :  { %330 = vsyncadd [#allocation4], 4294966272 }
 0x1f7   :  { %181 = vsyncpa [#allocation3], 1 }
 0x1f8   :  { %182 = vsyncpa [#allocation6], 1 }
 0x1f9   :  { %183 = vsyncpa [#allocation4], 1 }

</bundles_post_ra>
